<compile_context>
chip_gen: v7x
topology: tpu7x:2x2x1
jax: 0.10.0
libtpu: 0.0.40
codegen_flags: <defaults>
</compile_context>

<pallas_src>
import jax
import jax.numpy as jnp
from jax.experimental import pallas as pl
from jax.experimental.pallas import tpu as pltpu


# ----------------------------------------------------------------------------
# Fused kernel: fc_in -> unrolled RK4 time loop -> single fc_out matmul.
# ----------------------------------------------------------------------------
def _fused_neural_ode_kernel(
    dts_ref,                # SMEM (max(T-1,1),) f32 : dt per interval
    x_ref,                  # VMEM (B, out_dim)
    w_in_ref, b_in_ref,     # (out_dim, hidden), (1, hidden)
    w1_ref, b1_ref,         # (hidden, hidden), (1, hidden)
    w2_ref, b2_ref,         # (hidden, hidden), (1, hidden)
    w_out_ref, b_out_ref,   # (hidden, out_dim), (1, out_dim)
    out_ref,                # VMEM (T*B, out_dim) : flat trajectory output
    traj_ref,               # VMEM scratch (T*B, hidden) : hidden trajectory
):
    batch = x_ref.shape[0]
    hidden = w1_ref.shape[0]
    out_dim = out_ref.shape[-1]
    n_t = traj_ref.shape[0] // batch          # static

    # --- hoisted loop invariants ---------------------------------------------
    w1 = w1_ref[...]
    w2 = w2_ref[...]
    b1 = jnp.broadcast_to(b1_ref[...], (batch, hidden))
    b2 = jnp.broadcast_to(b2_ref[...], (batch, hidden))

    def f(y):  # ODEFunc: fc2(relu(fc1(y)))
        z = jnp.maximum(
            jnp.dot(y, w1, preferred_element_type=jnp.float32) + b1, 0.0
        )
        return jnp.dot(z, w2, preferred_element_type=jnp.float32) + b2

    # --- h0 = fc_in(x) ---------------------------------------------------------
    h0 = (
        jnp.dot(x_ref[...], w_in_ref[...], preferred_element_type=jnp.float32)
        + jnp.broadcast_to(b_in_ref[...], (batch, hidden))
    )
    traj_ref[pl.ds(0, batch), :] = h0

    # --- T-1 fused RK4 steps, h carried in vregs -------------------------------
    def rk4_step(i, h):
        dt = dts_ref[i]
        k1 = f(h)
        k2 = f(h + (0.5 * dt) * k1)
        k3 = f(h + (0.5 * dt) * k2)
        k4 = f(h + dt * k3)
        h_new = h + (dt / 6.0) * (k1 + 2.0 * k2 + 2.0 * k3 + k4)
        row = pl.multiple_of((i + 1) * batch, batch)
        traj_ref[pl.ds(row, batch), :] = h_new
        return h_new

    jax.lax.fori_loop(0, n_t - 1, rk4_step, h0, unroll=True)

    # --- fc_out on the full trajectory: one (T*B,H)@(H,O) matmul, one store ----
    y = (
        jnp.dot(traj_ref[...], w_out_ref[...], preferred_element_type=jnp.float32)
        + jnp.broadcast_to(b_out_ref[...], (n_t * batch, out_dim))
    )
    out_ref[...] = y.astype(out_ref.dtype)


# ----------------------------------------------------------------------------
# Wrapper
# ----------------------------------------------------------------------------
@jax.jit
def neural_ode_forward(params, x, t_span):
    """x: (B, output_dim), t_span: (T,)  ->  (T, B, output_dim)."""
    w_in, b_in = params["fc_in"]
    w_out, b_out = params["fc_out"]
    w1, b1 = params["ode_fc1"]
    w2, b2 = params["ode_fc2"]

    batch, _ = x.shape
    hidden = w_in.shape[1]
    out_dim = w_out.shape[1]
    n_t = t_span.shape[0]

    if n_t > 1:
        dts = (t_span[1:] - t_span[:-1]).astype(jnp.float32)   # (T-1,)
    else:
        dts = jnp.zeros((1,), jnp.float32)   # T=1: loop never reads it

    vmem = pltpu.MemorySpace.VMEM
    smem = pltpu.MemorySpace.SMEM

    out_flat = pl.pallas_call(
        _fused_neural_ode_kernel,
        out_shape=jax.ShapeDtypeStruct((n_t * batch, out_dim), jnp.float32),
        in_specs=[
            pl.BlockSpec(memory_space=smem),   # dts
            pl.BlockSpec(memory_space=vmem),   # x
            pl.BlockSpec(memory_space=vmem),   # w_in
            pl.BlockSpec(memory_space=vmem),   # b_in
            pl.BlockSpec(memory_space=vmem),   # w1
            pl.BlockSpec(memory_space=vmem),   # b1
            pl.BlockSpec(memory_space=vmem),   # w2
            pl.BlockSpec(memory_space=vmem),   # b2
            pl.BlockSpec(memory_space=vmem),   # w_out
            pl.BlockSpec(memory_space=vmem),   # b_out
        ],
        out_specs=pl.BlockSpec(memory_space=vmem),
        scratch_shapes=[pltpu.VMEM((n_t * batch, hidden), jnp.float32)],
    )(dts, x, w_in, b_in, w1, b1, w2, b2, w_out, b_out)

    return out_flat.reshape(n_t, batch, out_dim)


# ----------------------------------------------------------------------------
# Params (deterministic init mimicking nn.Linear's U(-1/sqrt(fan_in), ...))
# ----------------------------------------------------------------------------
def init_linear_params(key, in_features, out_features):
    kw, kb = jax.random.split(key)
    bound = 1.0 / jnp.sqrt(jnp.float32(in_features))
    # stored as (in, out) = PyTorch W.T
    w_t = jax.random.uniform(
        kw, (in_features, out_features), jnp.float32, -bound, bound
    )
    b = jax.random.uniform(kb, (1, out_features), jnp.float32, -bound, bound)
    return w_t, b


def init_neural_ode_params(key, hidden_dim, output_dim):
    k1, k2, k3, k4 = jax.random.split(key, 4)
    return {
        "fc_in": init_linear_params(k1, output_dim, hidden_dim),
        "fc_out": init_linear_params(k2, hidden_dim, output_dim),
        "ode_fc1": init_linear_params(k3, hidden_dim, hidden_dim),
        "ode_fc2": init_linear_params(k4, hidden_dim, hidden_dim),
    }


# ----------------------------------------------------------------------------
# Pure-JAX reference (same fixed-step RK4 semantics) for correctness check
# ----------------------------------------------------------------------------
def neural_ode_reference(params, x, t_span):
    w_in, b_in = params["fc_in"]
    w_out, b_out = params["fc_out"]
    w1, b1 = params["ode_fc1"]
    w2, b2 = params["ode_fc2"]
    hp = jax.lax.Precision.HIGHEST

    def lin(v, w, b):
        return jnp.dot(v, w, precision=hp) + b

    def f(y):
        return lin(jnp.maximum(lin(y, w1, b1), 0.0), w2, b2)

    h0 = lin(x, w_in, b_in)
    dts = t_span[1:] - t_span[:-1]

    def step(h, dt):
        k1 = f(h)
        k2 = f(h + 0.5 * dt * k1)
        k3 = f(h + 0.5 * dt * k2)
        k4 = f(h + dt * k3)
        hn = h + (dt / 6.0) * (k1 + 2.0 * k2 + 2.0 * k3 + k4)
        return hn, hn

    _, rest = jax.lax.scan(step, h0, dts)
    traj = jnp.concatenate([h0[None], rest], axis=0)  # (T, B, hidden)
    return lin(traj, w_out, b_out)                    # (T, B, out_dim)


if __name__ == "__main__":
    hidden_dim = 32
    output_dim = 8
    batch = 8
    n_times = 5

    key = jax.random.PRNGKey(0)
    k_params, k_x = jax.random.split(key)

    params = init_neural_ode_params(k_params, hidden_dim, output_dim)
    x = jax.random.normal(k_x, (batch, output_dim), jnp.float32)
    t_span = jnp.linspace(0.0, 1.0, n_times, dtype=jnp.float32)

    out = neural_ode_forward(params, x, t_span)
    out = jax.block_until_ready(out)

    assert out.shape == (n_times, batch, output_dim)
    assert bool(jnp.all(jnp.isfinite(out)))

    ref = neural_ode_reference(params, x, t_span)
    assert jnp.allclose(out, ref, atol=1e-3, rtol=1e-3), float(
        jnp.max(jnp.abs(out - ref))
    )

    print("KERNEL_OK")
</pallas_src>

<mosaic_0001>
module attributes {stable_mosaic.version = 11 : i64} {
  func.func @_fused_neural_ode_kernel(%arg0: memref<4xf32, #tpu.memory_space<smem>>, %arg1: memref<8x8xf32, #tpu.memory_space<vmem>>, %arg2: memref<8x32xf32, #tpu.memory_space<vmem>>, %arg3: memref<1x32xf32, #tpu.memory_space<vmem>>, %arg4: memref<32x32xf32, #tpu.memory_space<vmem>>, %arg5: memref<1x32xf32, #tpu.memory_space<vmem>>, %arg6: memref<32x32xf32, #tpu.memory_space<vmem>>, %arg7: memref<1x32xf32, #tpu.memory_space<vmem>>, %arg8: memref<32x8xf32, #tpu.memory_space<vmem>>, %arg9: memref<1x8xf32, #tpu.memory_space<vmem>>, %arg10: memref<40x8xf32, #tpu.memory_space<vmem>>, %arg11: memref<40x32xf32, #tpu.memory_space<vmem>>) attributes {dimension_semantics = [], scalar_prefetch = 0 : i64, scratch_operands = 1 : i64, tpu.core_type = #tpu.core_type<tc>} {
    %c0 = arith.constant 0 : index
    %c0_0 = arith.constant 0 : index
    %0 = vector.load %arg4[%c0, %c0_0] : memref<32x32xf32, #tpu.memory_space<vmem>>, vector<32x32xf32>
    %c0_1 = arith.constant 0 : index
    %c0_2 = arith.constant 0 : index
    %1 = vector.load %arg6[%c0_1, %c0_2] : memref<32x32xf32, #tpu.memory_space<vmem>>, vector<32x32xf32>
    %c0_3 = arith.constant 0 : index
    %c0_4 = arith.constant 0 : index
    %2 = vector.load %arg5[%c0_3, %c0_4] : memref<1x32xf32, #tpu.memory_space<vmem>>, vector<1x32xf32>
    %3 = vector.shape_cast %2 : vector<1x32xf32> to vector<1x32xf32>
    %4 = vector.broadcast %3 : vector<1x32xf32> to vector<8x32xf32>
    %c0_5 = arith.constant 0 : index
    %c0_6 = arith.constant 0 : index
    %5 = vector.load %arg7[%c0_5, %c0_6] : memref<1x32xf32, #tpu.memory_space<vmem>>, vector<1x32xf32>
    %6 = vector.shape_cast %5 : vector<1x32xf32> to vector<1x32xf32>
    %7 = vector.broadcast %6 : vector<1x32xf32> to vector<8x32xf32>
    %c0_7 = arith.constant 0 : index
    %c0_8 = arith.constant 0 : index
    %8 = vector.load %arg1[%c0_7, %c0_8] : memref<8x8xf32, #tpu.memory_space<vmem>>, vector<8x8xf32>
    %c0_9 = arith.constant 0 : index
    %c0_10 = arith.constant 0 : index
    %9 = vector.load %arg2[%c0_9, %c0_10] : memref<8x32xf32, #tpu.memory_space<vmem>>, vector<8x32xf32>
    %cst = arith.constant dense<0.000000e+00> : vector<8x32xf32>
    %10 = tpu.matmul %8, %9, %cst {dimension_numbers = #tpu.dot_dimension_numbers<[1], [0], [0], [1], [0, 0, 1, 1], [], []>} : vector<8x8xf32>, vector<8x32xf32>, vector<8x32xf32> -> vector<8x32xf32>
    %c0_11 = arith.constant 0 : index
    %c0_12 = arith.constant 0 : index
    %11 = vector.load %arg3[%c0_11, %c0_12] : memref<1x32xf32, #tpu.memory_space<vmem>>, vector<1x32xf32>
    %12 = vector.shape_cast %11 : vector<1x32xf32> to vector<1x32xf32>
    %13 = vector.broadcast %12 : vector<1x32xf32> to vector<8x32xf32>
    %14 = arith.addf %10, %13 : vector<8x32xf32>
    %c0_13 = arith.constant 0 : index
    %c0_14 = arith.constant 0 : index
    %15 = vector.load %arg11[%c0_13, %c0_14] : memref<40x32xf32, #tpu.memory_space<vmem>>, vector<8x32xf32>
    tpu.vector_store %arg11[%c0_13, %c0_14], %14 {strides = array<i32>} : memref<40x32xf32, #tpu.memory_space<vmem>>, vector<8x32xf32>,
    %c0_i32 = arith.constant 0 : i32
    %16 = arith.index_cast %c0_i32 : i32 to index
    %17 = memref.load %arg0[%16] : memref<4xf32, #tpu.memory_space<smem>>
    %cst_15 = arith.constant dense<0.000000e+00> : vector<8x32xf32>
    %18 = tpu.matmul %14, %0, %cst_15 {dimension_numbers = #tpu.dot_dimension_numbers<[1], [0], [0], [1], [0, 0, 1, 1], [], []>} : vector<8x32xf32>, vector<32x32xf32>, vector<8x32xf32> -> vector<8x32xf32>
    %19 = arith.addf %18, %4 : vector<8x32xf32>
    %cst_16 = arith.constant 0.000000e+00 : f32
    %20 = vector.broadcast %cst_16 : f32 to vector<8x32xf32>
    %21 = arith.maximumf %19, %20 : vector<8x32xf32>
    %cst_17 = arith.constant dense<0.000000e+00> : vector<8x32xf32>
    %22 = tpu.matmul %21, %1, %cst_17 {dimension_numbers = #tpu.dot_dimension_numbers<[1], [0], [0], [1], [0, 0, 1, 1], [], []>} : vector<8x32xf32>, vector<32x32xf32>, vector<8x32xf32> -> vector<8x32xf32>
    %23 = arith.addf %22, %7 : vector<8x32xf32>
    %cst_18 = arith.constant 5.000000e-01 : f32
    %24 = arith.mulf %cst_18, %17 : f32
    %25 = vector.broadcast %24 : f32 to vector<8x32xf32>
    %26 = arith.mulf %25, %23 : vector<8x32xf32>
    %27 = arith.addf %14, %26 : vector<8x32xf32>
    %cst_19 = arith.constant dense<0.000000e+00> : vector<8x32xf32>
    %28 = tpu.matmul %27, %0, %cst_19 {dimension_numbers = #tpu.dot_dimension_numbers<[1], [0], [0], [1], [0, 0, 1, 1], [], []>} : vector<8x32xf32>, vector<32x32xf32>, vector<8x32xf32> -> vector<8x32xf32>
    %29 = arith.addf %28, %4 : vector<8x32xf32>
    %cst_20 = arith.constant 0.000000e+00 : f32
    %30 = vector.broadcast %cst_20 : f32 to vector<8x32xf32>
    %31 = arith.maximumf %29, %30 : vector<8x32xf32>
    %cst_21 = arith.constant dense<0.000000e+00> : vector<8x32xf32>
    %32 = tpu.matmul %31, %1, %cst_21 {dimension_numbers = #tpu.dot_dimension_numbers<[1], [0], [0], [1], [0, 0, 1, 1], [], []>} : vector<8x32xf32>, vector<32x32xf32>, vector<8x32xf32> -> vector<8x32xf32>
    %33 = arith.addf %32, %7 : vector<8x32xf32>
    %cst_22 = arith.constant 5.000000e-01 : f32
    %34 = arith.mulf %cst_22, %17 : f32
    %35 = vector.broadcast %34 : f32 to vector<8x32xf32>
    %36 = arith.mulf %35, %33 : vector<8x32xf32>
    %37 = arith.addf %14, %36 : vector<8x32xf32>
    %cst_23 = arith.constant dense<0.000000e+00> : vector<8x32xf32>
    %38 = tpu.matmul %37, %0, %cst_23 {dimension_numbers = #tpu.dot_dimension_numbers<[1], [0], [0], [1], [0, 0, 1, 1], [], []>} : vector<8x32xf32>, vector<32x32xf32>, vector<8x32xf32> -> vector<8x32xf32>
    %39 = arith.addf %38, %4 : vector<8x32xf32>
    %cst_24 = arith.constant 0.000000e+00 : f32
    %40 = vector.broadcast %cst_24 : f32 to vector<8x32xf32>
    %41 = arith.maximumf %39, %40 : vector<8x32xf32>
    %cst_25 = arith.constant dense<0.000000e+00> : vector<8x32xf32>
    %42 = tpu.matmul %41, %1, %cst_25 {dimension_numbers = #tpu.dot_dimension_numbers<[1], [0], [0], [1], [0, 0, 1, 1], [], []>} : vector<8x32xf32>, vector<32x32xf32>, vector<8x32xf32> -> vector<8x32xf32>
    %43 = arith.addf %42, %7 : vector<8x32xf32>
    %44 = vector.broadcast %17 : f32 to vector<8x32xf32>
    %45 = arith.mulf %44, %43 : vector<8x32xf32>
    %46 = arith.addf %14, %45 : vector<8x32xf32>
    %cst_26 = arith.constant dense<0.000000e+00> : vector<8x32xf32>
    %47 = tpu.matmul %46, %0, %cst_26 {dimension_numbers = #tpu.dot_dimension_numbers<[1], [0], [0], [1], [0, 0, 1, 1], [], []>} : vector<8x32xf32>, vector<32x32xf32>, vector<8x32xf32> -> vector<8x32xf32>
    %48 = arith.addf %47, %4 : vector<8x32xf32>
    %cst_27 = arith.constant 0.000000e+00 : f32
    %49 = vector.broadcast %cst_27 : f32 to vector<8x32xf32>
    %50 = arith.maximumf %48, %49 : vector<8x32xf32>
    %cst_28 = arith.constant dense<0.000000e+00> : vector<8x32xf32>
    %51 = tpu.matmul %50, %1, %cst_28 {dimension_numbers = #tpu.dot_dimension_numbers<[1], [0], [0], [1], [0, 0, 1, 1], [], []>} : vector<8x32xf32>, vector<32x32xf32>, vector<8x32xf32> -> vector<8x32xf32>
    %52 = arith.addf %51, %7 : vector<8x32xf32>
    %cst_29 = arith.constant 6.000000e+00 : f32
    %53 = arith.divf %17, %cst_29 : f32
    %cst_30 = arith.constant 2.000000e+00 : f32
    %54 = vector.broadcast %cst_30 : f32 to vector<8x32xf32>
    %55 = arith.mulf %54, %33 : vector<8x32xf32>
    %56 = arith.addf %23, %55 : vector<8x32xf32>
    %cst_31 = arith.constant 2.000000e+00 : f32
    %57 = vector.broadcast %cst_31 : f32 to vector<8x32xf32>
    %58 = arith.mulf %57, %43 : vector<8x32xf32>
    %59 = arith.addf %56, %58 : vector<8x32xf32>
    %60 = arith.addf %59, %52 : vector<8x32xf32>
    %61 = vector.broadcast %53 : f32 to vector<8x32xf32>
    %62 = arith.mulf %61, %60 : vector<8x32xf32>
    %63 = arith.addf %14, %62 : vector<8x32xf32>
    %c1_i32 = arith.constant 1 : i32
    %64 = arith.addi %c0_i32, %c1_i32 : i32
    %c8_i32 = arith.constant 8 : i32
    %65 = arith.muli %64, %c8_i32 : i32
    %66 = tpu.assume_multiple %65, 8 : i32
    %67 = arith.index_cast %66 : i32 to index
    %c0_32 = arith.constant 0 : index
    %68 = vector.load %arg11[%67, %c0_32] : memref<40x32xf32, #tpu.memory_space<vmem>>, vector<8x32xf32>
    tpu.vector_store %arg11[%67, %c0_32], %63 {strides = array<i32>} : memref<40x32xf32, #tpu.memory_space<vmem>>, vector<8x32xf32>,
    %c1_i32_33 = arith.constant 1 : i32
    %69 = arith.index_cast %c1_i32_33 : i32 to index
    %70 = memref.load %arg0[%69] : memref<4xf32, #tpu.memory_space<smem>>
    %cst_34 = arith.constant dense<0.000000e+00> : vector<8x32xf32>
    %71 = tpu.matmul %63, %0, %cst_34 {dimension_numbers = #tpu.dot_dimension_numbers<[1], [0], [0], [1], [0, 0, 1, 1], [], []>} : vector<8x32xf32>, vector<32x32xf32>, vector<8x32xf32> -> vector<8x32xf32>
    %72 = arith.addf %71, %4 : vector<8x32xf32>
    %cst_35 = arith.constant 0.000000e+00 : f32
    %73 = vector.broadcast %cst_35 : f32 to vector<8x32xf32>
    %74 = arith.maximumf %72, %73 : vector<8x32xf32>
    %cst_36 = arith.constant dense<0.000000e+00> : vector<8x32xf32>
    %75 = tpu.matmul %74, %1, %cst_36 {dimension_numbers = #tpu.dot_dimension_numbers<[1], [0], [0], [1], [0, 0, 1, 1], [], []>} : vector<8x32xf32>, vector<32x32xf32>, vector<8x32xf32> -> vector<8x32xf32>
    %76 = arith.addf %75, %7 : vector<8x32xf32>
    %cst_37 = arith.constant 5.000000e-01 : f32
    %77 = arith.mulf %cst_37, %70 : f32
    %78 = vector.broadcast %77 : f32 to vector<8x32xf32>
    %79 = arith.mulf %78, %76 : vector<8x32xf32>
    %80 = arith.addf %63, %79 : vector<8x32xf32>
    %cst_38 = arith.constant dense<0.000000e+00> : vector<8x32xf32>
    %81 = tpu.matmul %80, %0, %cst_38 {dimension_numbers = #tpu.dot_dimension_numbers<[1], [0], [0], [1], [0, 0, 1, 1], [], []>} : vector<8x32xf32>, vector<32x32xf32>, vector<8x32xf32> -> vector<8x32xf32>
    %82 = arith.addf %81, %4 : vector<8x32xf32>
    %cst_39 = arith.constant 0.000000e+00 : f32
    %83 = vector.broadcast %cst_39 : f32 to vector<8x32xf32>
    %84 = arith.maximumf %82, %83 : vector<8x32xf32>
    %cst_40 = arith.constant dense<0.000000e+00> : vector<8x32xf32>
    %85 = tpu.matmul %84, %1, %cst_40 {dimension_numbers = #tpu.dot_dimension_numbers<[1], [0], [0], [1], [0, 0, 1, 1], [], []>} : vector<8x32xf32>, vector<32x32xf32>, vector<8x32xf32> -> vector<8x32xf32>
    %86 = arith.addf %85, %7 : vector<8x32xf32>
    %cst_41 = arith.constant 5.000000e-01 : f32
    %87 = arith.mulf %cst_41, %70 : f32
    %88 = vector.broadcast %87 : f32 to vector<8x32xf32>
    %89 = arith.mulf %88, %86 : vector<8x32xf32>
    %90 = arith.addf %63, %89 : vector<8x32xf32>
    %cst_42 = arith.constant dense<0.000000e+00> : vector<8x32xf32>
    %91 = tpu.matmul %90, %0, %cst_42 {dimension_numbers = #tpu.dot_dimension_numbers<[1], [0], [0], [1], [0, 0, 1, 1], [], []>} : vector<8x32xf32>, vector<32x32xf32>, vector<8x32xf32> -> vector<8x32xf32>
    %92 = arith.addf %91, %4 : vector<8x32xf32>
    %cst_43 = arith.constant 0.000000e+00 : f32
    %93 = vector.broadcast %cst_43 : f32 to vector<8x32xf32>
    %94 = arith.maximumf %92, %93 : vector<8x32xf32>
    %cst_44 = arith.constant dense<0.000000e+00> : vector<8x32xf32>
    %95 = tpu.matmul %94, %1, %cst_44 {dimension_numbers = #tpu.dot_dimension_numbers<[1], [0], [0], [1], [0, 0, 1, 1], [], []>} : vector<8x32xf32>, vector<32x32xf32>, vector<8x32xf32> -> vector<8x32xf32>
    %96 = arith.addf %95, %7 : vector<8x32xf32>
    %97 = vector.broadcast %70 : f32 to vector<8x32xf32>
    %98 = arith.mulf %97, %96 : vector<8x32xf32>
    %99 = arith.addf %63, %98 : vector<8x32xf32>
    %cst_45 = arith.constant dense<0.000000e+00> : vector<8x32xf32>
    %100 = tpu.matmul %99, %0, %cst_45 {dimension_numbers = #tpu.dot_dimension_numbers<[1], [0], [0], [1], [0, 0, 1, 1], [], []>} : vector<8x32xf32>, vector<32x32xf32>, vector<8x32xf32> -> vector<8x32xf32>
    %101 = arith.addf %100, %4 : vector<8x32xf32>
    %cst_46 = arith.constant 0.000000e+00 : f32
    %102 = vector.broadcast %cst_46 : f32 to vector<8x32xf32>
    %103 = arith.maximumf %101, %102 : vector<8x32xf32>
    %cst_47 = arith.constant dense<0.000000e+00> : vector<8x32xf32>
    %104 = tpu.matmul %103, %1, %cst_47 {dimension_numbers = #tpu.dot_dimension_numbers<[1], [0], [0], [1], [0, 0, 1, 1], [], []>} : vector<8x32xf32>, vector<32x32xf32>, vector<8x32xf32> -> vector<8x32xf32>
    %105 = arith.addf %104, %7 : vector<8x32xf32>
    %cst_48 = arith.constant 6.000000e+00 : f32
    %106 = arith.divf %70, %cst_48 : f32
    %cst_49 = arith.constant 2.000000e+00 : f32
    %107 = vector.broadcast %cst_49 : f32 to vector<8x32xf32>
    %108 = arith.mulf %107, %86 : vector<8x32xf32>
    %109 = arith.addf %76, %108 : vector<8x32xf32>
    %cst_50 = arith.constant 2.000000e+00 : f32
    %110 = vector.broadcast %cst_50 : f32 to vector<8x32xf32>
    %111 = arith.mulf %110, %96 : vector<8x32xf32>
    %112 = arith.addf %109, %111 : vector<8x32xf32>
    %113 = arith.addf %112, %105 : vector<8x32xf32>
    %114 = vector.broadcast %106 : f32 to vector<8x32xf32>
    %115 = arith.mulf %114, %113 : vector<8x32xf32>
    %116 = arith.addf %63, %115 : vector<8x32xf32>
    %c1_i32_51 = arith.constant 1 : i32
    %117 = arith.addi %c1_i32_33, %c1_i32_51 : i32
    %c8_i32_52 = arith.constant 8 : i32
    %118 = arith.muli %117, %c8_i32_52 : i32
    %119 = tpu.assume_multiple %118, 8 : i32
    %120 = arith.index_cast %119 : i32 to index
    %c0_53 = arith.constant 0 : index
    %121 = vector.load %arg11[%120, %c0_53] : memref<40x32xf32, #tpu.memory_space<vmem>>, vector<8x32xf32>
    tpu.vector_store %arg11[%120, %c0_53], %116 {strides = array<i32>} : memref<40x32xf32, #tpu.memory_space<vmem>>, vector<8x32xf32>,
    %c2_i32 = arith.constant 2 : i32
    %122 = arith.index_cast %c2_i32 : i32 to index
    %123 = memref.load %arg0[%122] : memref<4xf32, #tpu.memory_space<smem>>
    %cst_54 = arith.constant dense<0.000000e+00> : vector<8x32xf32>
    %124 = tpu.matmul %116, %0, %cst_54 {dimension_numbers = #tpu.dot_dimension_numbers<[1], [0], [0], [1], [0, 0, 1, 1], [], []>} : vector<8x32xf32>, vector<32x32xf32>, vector<8x32xf32> -> vector<8x32xf32>
    %125 = arith.addf %124, %4 : vector<8x32xf32>
    %cst_55 = arith.constant 0.000000e+00 : f32
    %126 = vector.broadcast %cst_55 : f32 to vector<8x32xf32>
    %127 = arith.maximumf %125, %126 : vector<8x32xf32>
    %cst_56 = arith.constant dense<0.000000e+00> : vector<8x32xf32>
    %128 = tpu.matmul %127, %1, %cst_56 {dimension_numbers = #tpu.dot_dimension_numbers<[1], [0], [0], [1], [0, 0, 1, 1], [], []>} : vector<8x32xf32>, vector<32x32xf32>, vector<8x32xf32> -> vector<8x32xf32>
    %129 = arith.addf %128, %7 : vector<8x32xf32>
    %cst_57 = arith.constant 5.000000e-01 : f32
    %130 = arith.mulf %cst_57, %123 : f32
    %131 = vector.broadcast %130 : f32 to vector<8x32xf32>
    %132 = arith.mulf %131, %129 : vector<8x32xf32>
    %133 = arith.addf %116, %132 : vector<8x32xf32>
    %cst_58 = arith.constant dense<0.000000e+00> : vector<8x32xf32>
    %134 = tpu.matmul %133, %0, %cst_58 {dimension_numbers = #tpu.dot_dimension_numbers<[1], [0], [0], [1], [0, 0, 1, 1], [], []>} : vector<8x32xf32>, vector<32x32xf32>, vector<8x32xf32> -> vector<8x32xf32>
    %135 = arith.addf %134, %4 : vector<8x32xf32>
    %cst_59 = arith.constant 0.000000e+00 : f32
    %136 = vector.broadcast %cst_59 : f32 to vector<8x32xf32>
    %137 = arith.maximumf %135, %136 : vector<8x32xf32>
    %cst_60 = arith.constant dense<0.000000e+00> : vector<8x32xf32>
    %138 = tpu.matmul %137, %1, %cst_60 {dimension_numbers = #tpu.dot_dimension_numbers<[1], [0], [0], [1], [0, 0, 1, 1], [], []>} : vector<8x32xf32>, vector<32x32xf32>, vector<8x32xf32> -> vector<8x32xf32>
    %139 = arith.addf %138, %7 : vector<8x32xf32>
    %cst_61 = arith.constant 5.000000e-01 : f32
    %140 = arith.mulf %cst_61, %123 : f32
    %141 = vector.broadcast %140 : f32 to vector<8x32xf32>
    %142 = arith.mulf %141, %139 : vector<8x32xf32>
    %143 = arith.addf %116, %142 : vector<8x32xf32>
    %cst_62 = arith.constant dense<0.000000e+00> : vector<8x32xf32>
    %144 = tpu.matmul %143, %0, %cst_62 {dimension_numbers = #tpu.dot_dimension_numbers<[1], [0], [0], [1], [0, 0, 1, 1], [], []>} : vector<8x32xf32>, vector<32x32xf32>, vector<8x32xf32> -> vector<8x32xf32>
    %145 = arith.addf %144, %4 : vector<8x32xf32>
    %cst_63 = arith.constant 0.000000e+00 : f32
    %146 = vector.broadcast %cst_63 : f32 to vector<8x32xf32>
    %147 = arith.maximumf %145, %146 : vector<8x32xf32>
    %cst_64 = arith.constant dense<0.000000e+00> : vector<8x32xf32>
    %148 = tpu.matmul %147, %1, %cst_64 {dimension_numbers = #tpu.dot_dimension_numbers<[1], [0], [0], [1], [0, 0, 1, 1], [], []>} : vector<8x32xf32>, vector<32x32xf32>, vector<8x32xf32> -> vector<8x32xf32>
    %149 = arith.addf %148, %7 : vector<8x32xf32>
    %150 = vector.broadcast %123 : f32 to vector<8x32xf32>
    %151 = arith.mulf %150, %149 : vector<8x32xf32>
    %152 = arith.addf %116, %151 : vector<8x32xf32>
    %cst_65 = arith.constant dense<0.000000e+00> : vector<8x32xf32>
    %153 = tpu.matmul %152, %0, %cst_65 {dimension_numbers = #tpu.dot_dimension_numbers<[1], [0], [0], [1], [0, 0, 1, 1], [], []>} : vector<8x32xf32>, vector<32x32xf32>, vector<8x32xf32> -> vector<8x32xf32>
    %154 = arith.addf %153, %4 : vector<8x32xf32>
    %cst_66 = arith.constant 0.000000e+00 : f32
    %155 = vector.broadcast %cst_66 : f32 to vector<8x32xf32>
    %156 = arith.maximumf %154, %155 : vector<8x32xf32>
    %cst_67 = arith.constant dense<0.000000e+00> : vector<8x32xf32>
    %157 = tpu.matmul %156, %1, %cst_67 {dimension_numbers = #tpu.dot_dimension_numbers<[1], [0], [0], [1], [0, 0, 1, 1], [], []>} : vector<8x32xf32>, vector<32x32xf32>, vector<8x32xf32> -> vector<8x32xf32>
    %158 = arith.addf %157, %7 : vector<8x32xf32>
    %cst_68 = arith.constant 6.000000e+00 : f32
    %159 = arith.divf %123, %cst_68 : f32
    %cst_69 = arith.constant 2.000000e+00 : f32
    %160 = vector.broadcast %cst_69 : f32 to vector<8x32xf32>
    %161 = arith.mulf %160, %139 : vector<8x32xf32>
    %162 = arith.addf %129, %161 : vector<8x32xf32>
    %cst_70 = arith.constant 2.000000e+00 : f32
    %163 = vector.broadcast %cst_70 : f32 to vector<8x32xf32>
    %164 = arith.mulf %163, %149 : vector<8x32xf32>
    %165 = arith.addf %162, %164 : vector<8x32xf32>
    %166 = arith.addf %165, %158 : vector<8x32xf32>
    %167 = vector.broadcast %159 : f32 to vector<8x32xf32>
    %168 = arith.mulf %167, %166 : vector<8x32xf32>
    %169 = arith.addf %116, %168 : vector<8x32xf32>
    %c1_i32_71 = arith.constant 1 : i32
    %170 = arith.addi %c2_i32, %c1_i32_71 : i32
    %c8_i32_72 = arith.constant 8 : i32
    %171 = arith.muli %170, %c8_i32_72 : i32
    %172 = tpu.assume_multiple %171, 8 : i32
    %173 = arith.index_cast %172 : i32 to index
    %c0_73 = arith.constant 0 : index
    %174 = vector.load %arg11[%173, %c0_73] : memref<40x32xf32, #tpu.memory_space<vmem>>, vector<8x32xf32>
    tpu.vector_store %arg11[%173, %c0_73], %169 {strides = array<i32>} : memref<40x32xf32, #tpu.memory_space<vmem>>, vector<8x32xf32>,
    %c3_i32 = arith.constant 3 : i32
    %175 = arith.index_cast %c3_i32 : i32 to index
    %176 = memref.load %arg0[%175] : memref<4xf32, #tpu.memory_space<smem>>
    %cst_74 = arith.constant dense<0.000000e+00> : vector<8x32xf32>
    %177 = tpu.matmul %169, %0, %cst_74 {dimension_numbers = #tpu.dot_dimension_numbers<[1], [0], [0], [1], [0, 0, 1, 1], [], []>} : vector<8x32xf32>, vector<32x32xf32>, vector<8x32xf32> -> vector<8x32xf32>
    %178 = arith.addf %177, %4 : vector<8x32xf32>
    %cst_75 = arith.constant 0.000000e+00 : f32
    %179 = vector.broadcast %cst_75 : f32 to vector<8x32xf32>
    %180 = arith.maximumf %178, %179 : vector<8x32xf32>
    %cst_76 = arith.constant dense<0.000000e+00> : vector<8x32xf32>
    %181 = tpu.matmul %180, %1, %cst_76 {dimension_numbers = #tpu.dot_dimension_numbers<[1], [0], [0], [1], [0, 0, 1, 1], [], []>} : vector<8x32xf32>, vector<32x32xf32>, vector<8x32xf32> -> vector<8x32xf32>
    %182 = arith.addf %181, %7 : vector<8x32xf32>
    %cst_77 = arith.constant 5.000000e-01 : f32
    %183 = arith.mulf %cst_77, %176 : f32
    %184 = vector.broadcast %183 : f32 to vector<8x32xf32>
    %185 = arith.mulf %184, %182 : vector<8x32xf32>
    %186 = arith.addf %169, %185 : vector<8x32xf32>
    %cst_78 = arith.constant dense<0.000000e+00> : vector<8x32xf32>
    %187 = tpu.matmul %186, %0, %cst_78 {dimension_numbers = #tpu.dot_dimension_numbers<[1], [0], [0], [1], [0, 0, 1, 1], [], []>} : vector<8x32xf32>, vector<32x32xf32>, vector<8x32xf32> -> vector<8x32xf32>
    %188 = arith.addf %187, %4 : vector<8x32xf32>
    %cst_79 = arith.constant 0.000000e+00 : f32
    %189 = vector.broadcast %cst_79 : f32 to vector<8x32xf32>
    %190 = arith.maximumf %188, %189 : vector<8x32xf32>
    %cst_80 = arith.constant dense<0.000000e+00> : vector<8x32xf32>
    %191 = tpu.matmul %190, %1, %cst_80 {dimension_numbers = #tpu.dot_dimension_numbers<[1], [0], [0], [1], [0, 0, 1, 1], [], []>} : vector<8x32xf32>, vector<32x32xf32>, vector<8x32xf32> -> vector<8x32xf32>
    %192 = arith.addf %191, %7 : vector<8x32xf32>
    %cst_81 = arith.constant 5.000000e-01 : f32
    %193 = arith.mulf %cst_81, %176 : f32
    %194 = vector.broadcast %193 : f32 to vector<8x32xf32>
    %195 = arith.mulf %194, %192 : vector<8x32xf32>
    %196 = arith.addf %169, %195 : vector<8x32xf32>
    %cst_82 = arith.constant dense<0.000000e+00> : vector<8x32xf32>
    %197 = tpu.matmul %196, %0, %cst_82 {dimension_numbers = #tpu.dot_dimension_numbers<[1], [0], [0], [1], [0, 0, 1, 1], [], []>} : vector<8x32xf32>, vector<32x32xf32>, vector<8x32xf32> -> vector<8x32xf32>
    %198 = arith.addf %197, %4 : vector<8x32xf32>
    %cst_83 = arith.constant 0.000000e+00 : f32
    %199 = vector.broadcast %cst_83 : f32 to vector<8x32xf32>
    %200 = arith.maximumf %198, %199 : vector<8x32xf32>
    %cst_84 = arith.constant dense<0.000000e+00> : vector<8x32xf32>
    %201 = tpu.matmul %200, %1, %cst_84 {dimension_numbers = #tpu.dot_dimension_numbers<[1], [0], [0], [1], [0, 0, 1, 1], [], []>} : vector<8x32xf32>, vector<32x32xf32>, vector<8x32xf32> -> vector<8x32xf32>
    %202 = arith.addf %201, %7 : vector<8x32xf32>
    %203 = vector.broadcast %176 : f32 to vector<8x32xf32>
    %204 = arith.mulf %203, %202 : vector<8x32xf32>
    %205 = arith.addf %169, %204 : vector<8x32xf32>
    %cst_85 = arith.constant dense<0.000000e+00> : vector<8x32xf32>
    %206 = tpu.matmul %205, %0, %cst_85 {dimension_numbers = #tpu.dot_dimension_numbers<[1], [0], [0], [1], [0, 0, 1, 1], [], []>} : vector<8x32xf32>, vector<32x32xf32>, vector<8x32xf32> -> vector<8x32xf32>
    %207 = arith.addf %206, %4 : vector<8x32xf32>
    %cst_86 = arith.constant 0.000000e+00 : f32
    %208 = vector.broadcast %cst_86 : f32 to vector<8x32xf32>
    %209 = arith.maximumf %207, %208 : vector<8x32xf32>
    %cst_87 = arith.constant dense<0.000000e+00> : vector<8x32xf32>
    %210 = tpu.matmul %209, %1, %cst_87 {dimension_numbers = #tpu.dot_dimension_numbers<[1], [0], [0], [1], [0, 0, 1, 1], [], []>} : vector<8x32xf32>, vector<32x32xf32>, vector<8x32xf32> -> vector<8x32xf32>
    %211 = arith.addf %210, %7 : vector<8x32xf32>
    %cst_88 = arith.constant 6.000000e+00 : f32
    %212 = arith.divf %176, %cst_88 : f32
    %cst_89 = arith.constant 2.000000e+00 : f32
    %213 = vector.broadcast %cst_89 : f32 to vector<8x32xf32>
    %214 = arith.mulf %213, %192 : vector<8x32xf32>
    %215 = arith.addf %182, %214 : vector<8x32xf32>
    %cst_90 = arith.constant 2.000000e+00 : f32
    %216 = vector.broadcast %cst_90 : f32 to vector<8x32xf32>
    %217 = arith.mulf %216, %202 : vector<8x32xf32>
    %218 = arith.addf %215, %217 : vector<8x32xf32>
    %219 = arith.addf %218, %211 : vector<8x32xf32>
    %220 = vector.broadcast %212 : f32 to vector<8x32xf32>
    %221 = arith.mulf %220, %219 : vector<8x32xf32>
    %222 = arith.addf %169, %221 : vector<8x32xf32>
    %c1_i32_91 = arith.constant 1 : i32
    %223 = arith.addi %c3_i32, %c1_i32_91 : i32
    %c8_i32_92 = arith.constant 8 : i32
    %224 = arith.muli %223, %c8_i32_92 : i32
    %225 = tpu.assume_multiple %224, 8 : i32
    %226 = arith.index_cast %225 : i32 to index
    %c0_93 = arith.constant 0 : index
    %227 = vector.load %arg11[%226, %c0_93] : memref<40x32xf32, #tpu.memory_space<vmem>>, vector<8x32xf32>
    tpu.vector_store %arg11[%226, %c0_93], %222 {strides = array<i32>} : memref<40x32xf32, #tpu.memory_space<vmem>>, vector<8x32xf32>,
    %c4_i32 = arith.constant 4 : i32
    %c0_94 = arith.constant 0 : index
    %c0_95 = arith.constant 0 : index
    %228 = vector.load %arg11[%c0_94, %c0_95] : memref<40x32xf32, #tpu.memory_space<vmem>>, vector<40x32xf32>
    %c0_96 = arith.constant 0 : index
    %c0_97 = arith.constant 0 : index
    %229 = vector.load %arg8[%c0_96, %c0_97] : memref<32x8xf32, #tpu.memory_space<vmem>>, vector<32x8xf32>
    %cst_98 = arith.constant dense<0.000000e+00> : vector<40x8xf32>
    %230 = tpu.matmul %228, %229, %cst_98 {dimension_numbers = #tpu.dot_dimension_numbers<[1], [0], [0], [1], [0, 0, 1, 1], [], []>} : vector<40x32xf32>, vector<32x8xf32>, vector<40x8xf32> -> vector<40x8xf32>
    %c0_99 = arith.constant 0 : index
    %c0_100 = arith.constant 0 : index
    %231 = vector.load %arg9[%c0_99, %c0_100] : memref<1x8xf32, #tpu.memory_space<vmem>>, vector<1x8xf32>
    %232 = vector.shape_cast %231 : vector<1x8xf32> to vector<1x8xf32>
    %233 = vector.broadcast %232 : vector<1x8xf32> to vector<40x8xf32>
    %234 = arith.addf %230, %233 : vector<40x8xf32>
    %c0_101 = arith.constant 0 : index
    %c0_102 = arith.constant 0 : index
    %235 = vector.load %arg10[%c0_101, %c0_102] : memref<40x8xf32, #tpu.memory_space<vmem>>, vector<40x8xf32>
    tpu.vector_store %arg10[%c0_101, %c0_102], %234 {strides = array<i32>} : memref<40x8xf32, #tpu.memory_space<vmem>>, vector<40x8xf32>,
    return
  }
}

</mosaic_0001>

<bundles_post_ra>
// kernel: neural_ode_forward.1
= control target key start
LH: loop header
LB: loop body
LE: loop exit
PB: predicated region body
PF: predicated region fallthrough
CT: control target
= control target key end

     0   :  { %15 = vsyncpa [#allocation6], 0  ;;  %s4204_s0 = inlined_call_operand.vmem [shape: f32[4], index: 0, kind: input, shape index: {}]   ;;  %s4205_s1 = inlined_call_operand.vmem [shape: f32[8,8], index: 1, kind: input, shape index: {}]   ;;  %s4206_s2 = inlined_call_operand.hbm [shape: f32[8,32], index: 2, kind: input, shape index: {}]   ;;  %s4207_s3 = inlined_call_operand.vmem [shape: f32[1,32], index: 3, kind: input, shape index: {}]   ;;  %s4208_s4 = inlined_call_operand.vmem [shape: f32[32,32], index: 4, kind: input, shape index: {}]   ;;  %s4209_s5 = inlined_call_operand.vmem [shape: f32[1,32], index: 5, kind: input, shape index: {}]   ;;  %s4210_s6 = inlined_call_operand.vmem [shape: f32[32,32], index: 6, kind: input, shape index: {}]   ;;  %s4211_s7 = inlined_call_operand.hbm [shape: f32[1,32], index: 7, kind: input, shape index: {}]   ;;  %s4212_s8 = inlined_call_operand.vmem [shape: f32[32,8], index: 8, kind: input, shape index: {}]   ;;  %s4213_s9 = inlined_call_operand.hbm [shape: f32[1,8], index: 9, kind: input, shape index: {}]   ;;  %s4214_s10 = inlined_call_operand.hbm [shape: f32[40,8], index: 10, kind: output, shape index: {}]  }
   0x1   :  { %16 = vsyncpa [#allocation4], 0 }
   0x2   :  { %17 = vsyncpa [#allocation9], 0 }
   0x3   :  { %18 = vsyncpa [#allocation5], 0  ;;  %s25_s15 = sshll.u32 %s4204_s0, 4  ;;  %s3692_s16 = smov [#allocation8]   ;;  %s26_s15 = int_to_ptr.vmem [resolvable:$true] %s25_s15 }
   0x4   :  { %s55_s17 = sshll.u32 %s3692_s16, 4  ;;  %s3584_s20 = scalar_lea.hbm %s4211_s7, 16  ;;  %s56_s17 = int_to_ptr.vmem [resolvable:$true] %s55_s17 }
   0x5   :  { %p3585_p0 = scmp.ne.s32.totalorder %s4211_s7, %s3584_s20  ;;  %p3588_p1 = scmp.lt.u32.totalorder %s3584_s20, %s4211_s7 }
   0x7   :  { %p3590_p2 = pnand %p3588_p1, %p3585_p0 }
   0x9   :  { %3593 = shalt.err (!%p3590_p2)
}
   0xa   :  { %s3594_s25 = scalar_lea.vmem %s56_s17, 16  ;;  %s3598_s0 = scalar_lea.vmem %s56_s17, 32 }
   0xb   :  { %p3595_p3 = scmp.ne.s32.totalorder %s56_s17, %s3594_s25  ;;  %p3599_p4 = scmp.lt.s32.totalorder %s56_s17, %s56_s17 }
   0xc   :  { %p3600_p5 = scmp.lt.s32.totalorder %s3598_s0, %s3594_s25 }
   0xe   :  { %p3601_p6 = por %p3600_p5, %p3599_p4 }
  0x10   :  { %p3602_p7 = pnand %p3601_p6, %p3595_p3 }
  0x12   :  { %3605 = shalt.err (!%p3602_p7)
}
  0x13   :  { %58 = dma.hbm_to_vmem [thread:$0]  %s4211_s7, 16, %s56_s17, [#allocation9]  }
  0x14   :  { %s3606_s28 = scalar_lea.vmem %s26_s15, 16  ;;  %p3611_p9 = scmp.lt.s32.totalorder %s26_s15, %s26_s15 }
  0x15   :  { %p3607_p8 = scmp.ne.s32.totalorder %s26_s15, %s3606_s28  ;;  %p3612_p10 = scmp.lt.s32.totalorder %s3606_s28, %s3606_s28 }
  0x17   :  { %p3613_p11 = por %p3612_p10, %p3611_p9 }
  0x19   :  { %p3614_p12 = pnand %p3613_p11, %p3607_p8 }
  0x1b   :  { %3617 = shalt.err (!%p3614_p12)
}
  0x1c   :  { %s3693_s29 = smov [#allocation3]   ;;  %s3694_s30 = smov [#allocation7]  }
  0x1d   :  { %28 = dma.vmem_to_smem %s26_s15, 16, %s3693_s29, [#allocation6]  }
  0x1e   :  { %s37_s11 = sshll.u32 %s3694_s30, 4  ;;  %s3695_s12 = smov [#allocation10]   ;;  %s38_s11 = int_to_ptr.vmem [resolvable:$true] %s37_s11 }
  0x1f   :  { %s67_s13 = sshll.u32 %s3695_s12, 4  ;;  %s3618_s18 = scalar_lea.hbm %s4206_s2, 128  ;;  %s68_s13 = int_to_ptr.vmem [resolvable:$true] %s67_s13 }
  0x20   :  { %p3619_p13 = scmp.ne.s32.totalorder %s4206_s2, %s3618_s18  ;;  %p3622_p0 = scmp.lt.u32.totalorder %s3618_s18, %s4206_s2 }
  0x22   :  { %p3624_p1 = pnand %p3622_p0, %p3619_p13 }
  0x24   :  { %3627 = shalt.err (!%p3624_p1)
}
  0x25   :  { %s3628_s15 = scalar_lea.vmem %s38_s11, 128  ;;  %p3633_p3 = scmp.lt.s32.totalorder %s38_s11, %s38_s11 }
  0x26   :  { %p3629_p2 = scmp.ne.s32.totalorder %s38_s11, %s3628_s15  ;;  %p3634_p4 = scmp.lt.s32.totalorder %s3628_s15, %s3628_s15 }
  0x28   :  { %p3635_p5 = por %p3634_p4, %p3633_p3 }
  0x2a   :  { %p3636_p6 = pnand %p3635_p5, %p3629_p2 }
  0x2c   :  { %3639 = shalt.err (!%p3636_p6)
}
  0x2d   :  { %40 = dma.hbm_to_vmem [thread:$0]  %s4206_s2, 128, %s38_s11, [#allocation4]  }
  0x2e   :  { %s3640_s25 = scalar_lea.hbm %s4213_s9, 16 }
  0x2f   :  { %p3641_p7 = scmp.ne.s32.totalorder %s4213_s9, %s3640_s25  ;;  %p3644_p8 = scmp.lt.u32.totalorder %s3640_s25, %s4213_s9 }
  0x31   :  { %p3646_p9 = pnand %p3644_p8, %p3641_p7 }
  0x33   :  { %3649 = shalt.err (!%p3646_p9)
}
  0x34   :  { %s3650_s29 = scalar_lea.vmem %s68_s13, 16  ;;  %s3654_s30 = scalar_lea.vmem %s68_s13, 32 }
  0x35   :  { %p3651_p10 = scmp.ne.s32.totalorder %s68_s13, %s3650_s29  ;;  %p3655_p11 = scmp.lt.s32.totalorder %s68_s13, %s68_s13 }
  0x36   :  { %p3656_p12 = scmp.lt.s32.totalorder %s3654_s30, %s3650_s29 }
  0x38   :  { %p3657_p13 = por %p3656_p12, %p3655_p11 }
  0x3a   :  { %p3658_p0 = pnand %p3657_p13, %p3651_p10 }
  0x3c   :  { %3661 = shalt.err (!%p3658_p0)
}
  0x3d   :  { %70 = dma.hbm_to_vmem [thread:$0]  %s4213_s9, 16, %s68_s13, [#allocation9]  }
  0x3e   :  { %3684 = dma.done.wait [#allocation6], 16  }
  0x3f   :  { %3685 = vsyncadd [#allocation6], 4294967280 }
  0x40   :  { %3686 = dma.done.wait [#allocation4], 128  }
  0x41   :  { %3687 = vsyncadd [#allocation4], 4294967168 }
  0x42   :  { %3688 = dma.done.wait [#allocation9], 32  }
  0x43   :  { %3689 = vsyncadd [#allocation9], 4294967264 }
  0x44   :  { %83 = sfence }
  0x45   :  { %v107_v0 = vld [vmem:[#allocation7] sm:$0xff]  ;;  %v106_v1 = vld [vmem:[%s4205_s1] sm:$0xff]  ;;  %vm115_vm0 = vcmask 64512   ;;  %v3696_v2 = vmov 0.0   ;;  %vm3697_vm1 = vmmov 0   ;;  %v3698_v6 = vmov 0.0|0.0  }
  0x46   :  { %2996 = vmatprep.subr.mxu0 %v3696_v2  ;;  %2998 = vmatprep.mubr.msk.f32.mxu0 %vm3697_vm1, %v3696_v2  ;;  %v84_v3 = vld [vmem:[%s4208_s4] sm:$0xff]  ;;  %v85_v4 = vld [vmem:[%s4208_s4 + $0x8] sm:$0xff]  ;;  %v86_v7 = vld [vmem:[%s4208_s4 + $0x10] sm:$0xff]  ;;  %vm189_vm2 = vcmask 261120   ;;  %s3957_s29 = sld [smem:[#allocation3 + $0x1]]  ;;  %s4035_s11 = sld [smem:[#allocation3 + $0x2]] }
  0x47   :  { %2997 = vmatpush3.msra.mxu0 %v107_v0  ;;  %v3808_v5 = vpack.c.bf16 %v85_v4, %v84_v3  ;;  %3388 = vmatprep.subr.bf16.mxu1 %v3698_v6  ;;  %v87_v8 = vld [vmem:[%s4208_s4 + $0x18] sm:$0xff]  ;;  %v88_v10 = vld [vmem:[%s4210_s6] sm:$0xff]  ;;  %v89_v11 = vld [vmem:[%s4210_s6 + $0x8] sm:$0xff]  ;;  %s4113_s9 = sld [smem:[#allocation3 + $0x3]]  ;;  %s3699_s21 = smov [#allocation11]  }
  0x48   :  { %2999 = vmatmul.mubr.msk.f32.vlgmr.msra.gmra.mrb[0].mxu0 %vm115_vm0, %v106_v1  ;;  %3376 = vmatprep.subr.bf16.mxu0 %v3698_v6  ;;  %v3827_v9 = vpack.c.bf16 %v87_v8, %v86_v7  ;;  %v2782_v12 = vld [vmem:[%s4207_s3] ss:$0 sm:$0xff]  ;;  %v3842_v14 = vpack.c.bf16 %v89_v11, %v88_v10  ;;  %v90_v17 = vld [vmem:[%s4210_s6 + $0x10] sm:$0xff]  ;;  %v91_v18 = vld [vmem:[%s4210_s6 + $0x18] sm:$0xff]  ;;  %s2766_s22 = sshll.u32 %s3699_s21, 4  ;;  %s2767_s22 = int_to_ptr.vmem [resolvable:$true] %s2766_s22 }
  0x49   :  { %3378 = vmatpush3.bf16.msra.mxu0 %v3808_v5  ;;  %3009 = vmatprep.mubr.msk.f32.mxu0 %vm3697_vm1, %v3696_v2  ;;  %v3860_v19 = vpack.c.bf16 %v91_v18, %v90_v17  ;;  %v3867_v20 = vld [vmem:[%s4209_s5] ss:$0 sm:$0xff]  ;;  %s3877_s5 = sld [smem:[#allocation3]]  ;;  %v3880_v25 = vld [vmem:[#allocation8] ss:$0 sm:$0xff]  ;;  %s3662_s23 = scalar_lea.vmem %s2767_s22, 640 }
  0x4a   :  { %3379 = vmatprep.subr.bf16.mxu0 %v3698_v6  ;;  %3390 = vmatpush3.bf16.msra.mxu1 %v3808_v5  ;;  %p3663_p1 = scmp.ne.s32.totalorder %s2767_s22, %s3662_s23  ;;  %p3667_p2 = scmp.lt.s32.totalorder %s2767_s22, %s2767_s22 }
  0x4b   :  { %3391 = vmatprep.subr.bf16.mxu1 %v3698_v6  ;;  %3031 = vmatprep.mubr.msk.f32.mxu1 %vm3697_vm1, %v3696_v2  ;;  %p3668_p3 = scmp.lt.s32.totalorder %s3662_s23, %s3662_s23 }
  0x4c   :  { %s950_s30 = smul.f32 0.5, %s3957_s29 }
  0x4d   :  { %3381 = vmatpush3.bf16.msra.mxu0 %v3827_v9  ;;  %s1402_s2 = smul.f32 0.16666667, %s3957_s29  ;;  %p3669_p4 = por %p3668_p3, %p3667_p2 }
  0x4e   :  { %3393 = vmatpush3.bf16.msra.mxu1 %v3827_v9  ;;  %3382 = vmatprep.subr.bf16.mxu0 %v3698_v6  ;;  %v951_v11 = vstv %s950_s30  ;;  %s1561_s12 = smul.f32 0.5, %s4035_s11 }
  0x4f   :  { %3400 = vmatprep.subr.bf16.mxu1 %v3698_v6  ;;  %s339_s6 = smul.f32 0.5, %s3877_s5  ;;  %v639_v47 = vstv %s3877_s5  ;;  %p3670_p5 = pnand %p3669_p4, %p3663_p1 }
  0x50   :  { %s791_s28 = smul.f32 0.16666667, %s3877_s5 }
  0x51   :  { %v340_v27 = vstv %s339_s6  ;;  %s2013_s14 = smul.f32 0.16666667, %s4035_s11 }
  0x52   :  { %v797_v62 = vstv %s791_s28  ;;  %s2172_s13 = smul.f32 0.5, %s4113_s9 }
 0x11b   :  { %v185_v13 = vpop.f32.mrb[0].mxu0 }
 0x11c   :  { %v3844_v15 = vadd.f32 %v2782_v12, %v185_v13  ;;  %v3000_v16 = vpop.f32.mrb[1].mxu0 }
 0x11e   :  { %190 = vst.msk [vmem:[#allocation2] sm:$0xff] %vm189_vm2, %v3844_v15  ;;  %3010 = vmatmul.mubr.msk.f32.vlgmr.msra.gmra.mrb[2].mxu0 %vm189_vm2, %v3844_v15 }
 0x11f   :  { %3384 = vmatpush3.bf16.msra.mxu0 %v3842_v14  ;;  %3020 = vmatprep.mubr.msk.f32.mxu0 %vm3697_vm1, %v3696_v2 }
 0x120   :  { %3385 = vmatprep.subr.bf16.mxu0 %v3698_v6 }
 0x123   :  { %3387 = vmatpush3.bf16.msra.mxu0 %v3860_v19 }
 0x124   :  { %3394 = vmatprep.subr.bf16.mxu0 %v3698_v6 }
 0x1f1   :  { %v261_v21 = vpop.f32.mrb[2].mxu0 }
 0x1f2   :  { %v262_v22 = vadd.f32 %v3867_v20, %v261_v21  ;;  %v3011_v23 = vpop.f32.mrb[3].mxu0 }
 0x1f4   :  { %v265_v24 = vmax.f32 %v262_v22, 0.0 }
 0x1f6   :  { %3021 = vmatmul.mubr.msk.f32.vlgmr.msra.gmra.mrb[4].mxu0 %vm189_vm2, %v265_v24 }
 0x1f7   :  { %3396 = vmatpush3.bf16.msra.mxu0 %v3842_v14  ;;  %3042 = vmatprep.mubr.msk.f32.mxu0 %vm3697_vm1, %v3696_v2 }
 0x1f8   :  { %3397 = vmatprep.subr.bf16.mxu0 %v3698_v6 }
 0x1fb   :  { %3399 = vmatpush3.bf16.msra.mxu0 %v3860_v19 }
 0x1fc   :  { %3406 = vmatprep.subr.bf16.mxu0 %v3698_v6 }
 0x2c9   :  { %v335_v26 = vpop.f32.mrb[4].mxu0 }
 0x2ca   :  { %v336_v28 = vadd.f32 %v3880_v25, %v335_v26  ;;  %v3022_v29 = vpop.f32.mrb[5].mxu0 }
 0x2cc   :  { %v341_v30 = vmul.f32 %v340_v27, %v336_v28 }
 0x2ce   :  { %v342_v31 = vadd.f32 %v341_v30, %v3844_v15 }
 0x2d0   :  { %3032 = vmatmul.mubr.msk.f32.vlgmr.msra.gmra.mrb[0].mxu1 %vm189_vm2, %v342_v31 }
 0x2d1   :  { %3402 = vmatpush3.bf16.msra.mxu1 %v3808_v5  ;;  %3053 = vmatprep.mubr.msk.f32.mxu1 %vm3697_vm1, %v3696_v2 }
 0x2d2   :  { %3403 = vmatprep.subr.bf16.mxu1 %v3698_v6 }
 0x2d5   :  { %3405 = vmatpush3.bf16.msra.mxu1 %v3827_v9 }
 0x2d6   :  { %3412 = vmatprep.subr.bf16.mxu1 %v3698_v6 }
 0x3a3   :  { %v412_v32 = vpop.f32.mrb[0].mxu1 }
 0x3a4   :  { %v413_v33 = vadd.f32 %v3867_v20, %v412_v32  ;;  %v3033_v34 = vpop.f32.mrb[1].mxu1 }
 0x3a6   :  { %v416_v35 = vmax.f32 %v413_v33, 0.0 }
 0x3a8   :  { %3043 = vmatmul.mubr.msk.f32.vlgmr.msra.gmra.mrb[6].mxu0 %vm189_vm2, %v416_v35  ;;  %v1250_v35 = vstv %s3957_s29 }
 0x3a9   :  { %3408 = vmatpush3.bf16.msra.mxu0 %v3842_v14  ;;  %3064 = vmatprep.mubr.msk.f32.mxu0 %vm3697_vm1, %v3696_v2 }
 0x3aa   :  { %3409 = vmatprep.subr.bf16.mxu0 %v3698_v6 }
 0x3ad   :  { %3411 = vmatpush3.bf16.msra.mxu0 %v3860_v19 }
 0x3ae   :  { %3418 = vmatprep.subr.bf16.mxu0 %v3698_v6 }
 0x47b   :  { %v486_v36 = vpop.f32.mrb[6].mxu0 }
 0x47c   :  { %v487_v37 = vadd.f32 %v3880_v25, %v486_v36  ;;  %v3044_v38 = vpop.f32.mrb[7].mxu0 }
 0x47e   :  { %v490_v39 = vmul.f32 %v487_v37, %v340_v27  ;;  %v792_v45 = vmul.f32 2.0, %v487_v37 }
 0x480   :  { %v491_v40 = vadd.f32 %v490_v39, %v3844_v15  ;;  %v793_v50 = vadd.f32 %v792_v45, %v336_v28 }
 0x482   :  { %3054 = vmatmul.mubr.msk.f32.vlgmr.msra.gmra.mrb[2].mxu1 %vm189_vm2, %v491_v40 }
 0x483   :  { %3414 = vmatpush3.bf16.msra.mxu1 %v3808_v5  ;;  %3075 = vmatprep.mubr.msk.f32.mxu1 %vm3697_vm1, %v3696_v2 }
 0x484   :  { %3415 = vmatprep.subr.bf16.mxu1 %v3698_v6 }
 0x487   :  { %3417 = vmatpush3.bf16.msra.mxu1 %v3827_v9 }
 0x488   :  { %3424 = vmatprep.subr.bf16.mxu1 %v3698_v6 }
 0x555   :  { %v561_v41 = vpop.f32.mrb[2].mxu1 }
 0x556   :  { %v562_v42 = vadd.f32 %v3867_v20, %v561_v41  ;;  %v3055_v43 = vpop.f32.mrb[3].mxu1 }
 0x558   :  { %v565_v44 = vmax.f32 %v562_v42, 0.0 }
 0x55a   :  { %3065 = vmatmul.mubr.msk.f32.vlgmr.msra.gmra.mrb[8].mxu0 %vm189_vm2, %v565_v44 }
 0x55b   :  { %3420 = vmatpush3.bf16.msra.mxu0 %v3842_v14  ;;  %3086 = vmatprep.mubr.msk.f32.mxu0 %vm3697_vm1, %v3696_v2 }
 0x55c   :  { %3421 = vmatprep.subr.bf16.mxu0 %v3698_v6 }
 0x55f   :  { %3423 = vmatpush3.bf16.msra.mxu0 %v3860_v19 }
 0x560   :  { %3430 = vmatprep.subr.bf16.mxu0 %v3698_v6 }
 0x62d   :  { %v635_v46 = vpop.f32.mrb[8].mxu0 }
 0x62e   :  { %v636_v48 = vadd.f32 %v3880_v25, %v635_v46  ;;  %v3066_v49 = vpop.f32.mrb[9].mxu0 }
 0x630   :  { %v640_v51 = vmul.f32 %v639_v47, %v636_v48  ;;  %v794_v52 = vmul.f32 2.0, %v636_v48 }
 0x632   :  { %v641_v53 = vadd.f32 %v640_v51, %v3844_v15  ;;  %v795_v54 = vadd.f32 %v794_v52, %v793_v50  ;;  %v1408_v50 = vstv %s1402_s2 }
 0x634   :  { %3076 = vmatmul.mubr.msk.f32.vlgmr.msra.gmra.mrb[4].mxu1 %vm189_vm2, %v641_v53 }
 0x635   :  { %3426 = vmatpush3.bf16.msra.mxu1 %v3808_v5  ;;  %3097 = vmatprep.mubr.msk.f32.mxu1 %vm3697_vm1, %v3696_v2 }
 0x636   :  { %3427 = vmatprep.subr.bf16.mxu1 %v3698_v6 }
 0x639   :  { %3429 = vmatpush3.bf16.msra.mxu1 %v3827_v9 }
 0x63a   :  { %3436 = vmatprep.subr.bf16.mxu1 %v3698_v6 }
 0x707   :  { %v711_v55 = vpop.f32.mrb[4].mxu1 }
 0x708   :  { %v712_v56 = vadd.f32 %v3867_v20, %v711_v55  ;;  %v3077_v57 = vpop.f32.mrb[5].mxu1 }
 0x70a   :  { %v715_v58 = vmax.f32 %v712_v56, 0.0 }
 0x70c   :  { %3087 = vmatmul.mubr.msk.f32.vlgmr.msra.gmra.mrb[10].mxu0 %vm189_vm2, %v715_v58 }
 0x70d   :  { %3432 = vmatpush3.bf16.msra.mxu0 %v3842_v14  ;;  %3108 = vmatprep.mubr.msk.f32.mxu0 %vm3697_vm1, %v3696_v2 }
 0x70e   :  { %3433 = vmatprep.subr.bf16.mxu0 %v3698_v6 }
 0x711   :  { %3435 = vmatpush3.bf16.msra.mxu0 %v3860_v19 }
 0x712   :  { %3442 = vmatprep.subr.bf16.mxu0 %v3698_v6 }
 0x7df   :  { %v785_v59 = vpop.f32.mrb[10].mxu0 }
 0x7e0   :  { %v786_v60 = vadd.f32 %v3880_v25, %v785_v59  ;;  %v3088_v61 = vpop.f32.mrb[11].mxu0  ;;  %v1562_v59 = vstv %s1561_s12 }
 0x7e2   :  { %v796_v63 = vadd.f32 %v795_v54, %v786_v60 }
 0x7e4   :  { %v798_v0 = vmul.f32 %v797_v62, %v796_v63 }
 0x7e6   :  { %v3937_v1 = vadd.f32 %v798_v0, %v3844_v15 }
 0x7e8   :  { %801 = vst.msk [vmem:[#allocation2 + $0x8] sm:$0xff] %vm189_vm2, %v3937_v1  ;;  %3098 = vmatmul.mubr.msk.f32.vlgmr.msra.gmra.mrb[6].mxu1 %vm189_vm2, %v3937_v1 }
 0x7e9   :  { %3438 = vmatpush3.bf16.msra.mxu1 %v3808_v5  ;;  %3119 = vmatprep.mubr.msk.f32.mxu1 %vm3697_vm1, %v3696_v2 }
 0x7ea   :  { %3439 = vmatprep.subr.bf16.mxu1 %v3698_v6 }
 0x7ed   :  { %3441 = vmatpush3.bf16.msra.mxu1 %v3827_v9 }
 0x7ee   :  { %3448 = vmatprep.subr.bf16.mxu1 %v3698_v6 }
 0x8bb   :  { %v872_v3 = vpop.f32.mrb[6].mxu1 }
 0x8bc   :  { %v873_v4 = vadd.f32 %v3867_v20, %v872_v3  ;;  %v3099_v7 = vpop.f32.mrb[7].mxu1 }
 0x8be   :  { %v876_v8 = vmax.f32 %v873_v4, 0.0 }
 0x8c0   :  { %3109 = vmatmul.mubr.msk.f32.vlgmr.msra.gmra.mrb[12].mxu0 %vm189_vm2, %v876_v8 }
 0x8c1   :  { %3444 = vmatpush3.bf16.msra.mxu0 %v3842_v14  ;;  %3130 = vmatprep.mubr.msk.f32.mxu0 %vm3697_vm1, %v3696_v2 }
 0x8c2   :  { %3445 = vmatprep.subr.bf16.mxu0 %v3698_v6 }
 0x8c5   :  { %3447 = vmatpush3.bf16.msra.mxu0 %v3860_v19 }
 0x8c6   :  { %3454 = vmatprep.subr.bf16.mxu0 %v3698_v6 }
 0x993   :  { %v946_v10 = vpop.f32.mrb[12].mxu0 }
 0x994   :  { %v947_v12 = vadd.f32 %v3880_v25, %v946_v10  ;;  %v3110_v13 = vpop.f32.mrb[13].mxu0 }
 0x996   :  { %v952_v15 = vmul.f32 %v951_v11, %v947_v12 }
 0x998   :  { %v953_v16 = vadd.f32 %v952_v15, %v3937_v1 }
 0x99a   :  { %3120 = vmatmul.mubr.msk.f32.vlgmr.msra.gmra.mrb[8].mxu1 %vm189_vm2, %v953_v16 }
 0x99b   :  { %3450 = vmatpush3.bf16.msra.mxu1 %v3808_v5  ;;  %3141 = vmatprep.mubr.msk.f32.mxu1 %vm3697_vm1, %v3696_v2 }
 0x99c   :  { %3451 = vmatprep.subr.bf16.mxu1 %v3698_v6 }
 0x99f   :  { %3453 = vmatpush3.bf16.msra.mxu1 %v3827_v9 }
 0x9a0   :  { %3460 = vmatprep.subr.bf16.mxu1 %v3698_v6 }
 0xa6d   :  { %v1023_v17 = vpop.f32.mrb[8].mxu1 }
 0xa6e   :  { %v1024_v18 = vadd.f32 %v3867_v20, %v1023_v17  ;;  %v3121_v21 = vpop.f32.mrb[9].mxu1 }
 0xa70   :  { %v1027_v22 = vmax.f32 %v1024_v18, 0.0 }
 0xa72   :  { %3131 = vmatmul.mubr.msk.f32.vlgmr.msra.gmra.mrb[14].mxu0 %vm189_vm2, %v1027_v22  ;;  %v1861_v22 = vstv %s4035_s11 }
 0xa73   :  { %3456 = vmatpush3.bf16.msra.mxu0 %v3842_v14  ;;  %3152 = vmatprep.mubr.msk.f32.mxu0 %vm3697_vm1, %v3696_v2 }
 0xa74   :  { %3457 = vmatprep.subr.bf16.mxu0 %v3698_v6 }
 0xa77   :  { %3459 = vmatpush3.bf16.msra.mxu0 %v3860_v19 }
 0xa78   :  { %3466 = vmatprep.subr.bf16.mxu0 %v3698_v6 }
 0xb45   :  { %v1097_v23 = vpop.f32.mrb[14].mxu0 }
 0xb46   :  { %v1098_v24 = vadd.f32 %v3880_v25, %v1097_v23  ;;  %v3132_v26 = vpop.f32.mrb[15].mxu0 }
 0xb48   :  { %v1101_v27 = vmul.f32 %v1098_v24, %v951_v11  ;;  %v1403_v33 = vmul.f32 2.0, %v1098_v24 }
 0xb4a   :  { %v1102_v28 = vadd.f32 %v1101_v27, %v3937_v1  ;;  %v1404_v38 = vadd.f32 %v1403_v33, %v947_v12 }
 0xb4c   :  { %3142 = vmatmul.mubr.msk.f32.vlgmr.msra.gmra.mrb[10].mxu1 %vm189_vm2, %v1102_v28 }
 0xb4d   :  { %3462 = vmatpush3.bf16.msra.mxu1 %v3808_v5  ;;  %3163 = vmatprep.mubr.msk.f32.mxu1 %vm3697_vm1, %v3696_v2 }
 0xb4e   :  { %3463 = vmatprep.subr.bf16.mxu1 %v3698_v6 }
 0xb51   :  { %3465 = vmatpush3.bf16.msra.mxu1 %v3827_v9 }
 0xb52   :  { %3472 = vmatprep.subr.bf16.mxu1 %v3698_v6 }
 0xc1f   :  { %v1172_v29 = vpop.f32.mrb[10].mxu1 }
 0xc20   :  { %v1173_v30 = vadd.f32 %v3867_v20, %v1172_v29  ;;  %v3143_v31 = vpop.f32.mrb[11].mxu1 }
 0xc22   :  { %v1176_v32 = vmax.f32 %v1173_v30, 0.0 }
 0xc24   :  { %3153 = vmatmul.mubr.msk.f32.vlgmr.msra.gmra.mrb[16].mxu0 %vm189_vm2, %v1176_v32 }
 0xc25   :  { %3468 = vmatpush3.bf16.msra.mxu0 %v3842_v14  ;;  %3174 = vmatprep.mubr.msk.f32.mxu0 %vm3697_vm1, %v3696_v2 }
 0xc26   :  { %3469 = vmatprep.subr.bf16.mxu0 %v3698_v6 }
 0xc29   :  { %3471 = vmatpush3.bf16.msra.mxu0 %v3860_v19 }
 0xc2a   :  { %3478 = vmatprep.subr.bf16.mxu0 %v3698_v6 }
 0xcf7   :  { %v1246_v34 = vpop.f32.mrb[16].mxu0 }
 0xcf8   :  { %v1247_v36 = vadd.f32 %v3880_v25, %v1246_v34  ;;  %v3154_v37 = vpop.f32.mrb[17].mxu0 }
 0xcfa   :  { %v1251_v39 = vmul.f32 %v1250_v35, %v1247_v36  ;;  %v1405_v40 = vmul.f32 2.0, %v1247_v36 }
 0xcfc   :  { %v1252_v41 = vadd.f32 %v1251_v39, %v3937_v1  ;;  %v1406_v42 = vadd.f32 %v1405_v40, %v1404_v38  ;;  %v2019_v38 = vstv %s2013_s14 }
 0xcfe   :  { %3164 = vmatmul.mubr.msk.f32.vlgmr.msra.gmra.mrb[12].mxu1 %vm189_vm2, %v1252_v41 }
 0xcff   :  { %3474 = vmatpush3.bf16.msra.mxu1 %v3808_v5  ;;  %3185 = vmatprep.mubr.msk.f32.mxu1 %vm3697_vm1, %v3696_v2 }
 0xd00   :  { %3475 = vmatprep.subr.bf16.mxu1 %v3698_v6 }
 0xd03   :  { %3477 = vmatpush3.bf16.msra.mxu1 %v3827_v9 }
 0xd04   :  { %3484 = vmatprep.subr.bf16.mxu1 %v3698_v6 }
 0xdd1   :  { %v1322_v43 = vpop.f32.mrb[12].mxu1 }
 0xdd2   :  { %v1323_v44 = vadd.f32 %v3867_v20, %v1322_v43  ;;  %v3165_v45 = vpop.f32.mrb[13].mxu1 }
 0xdd4   :  { %v1326_v46 = vmax.f32 %v1323_v44, 0.0 }
 0xdd6   :  { %3175 = vmatmul.mubr.msk.f32.vlgmr.msra.gmra.mrb[18].mxu0 %vm189_vm2, %v1326_v46 }
 0xdd7   :  { %3480 = vmatpush3.bf16.msra.mxu0 %v3842_v14  ;;  %3196 = vmatprep.mubr.msk.f32.mxu0 %vm3697_vm1, %v3696_v2 }
 0xdd8   :  { %3481 = vmatprep.subr.bf16.mxu0 %v3698_v6 }
 0xddb   :  { %3483 = vmatpush3.bf16.msra.mxu0 %v3860_v19 }
 0xddc   :  { %3490 = vmatprep.subr.bf16.mxu0 %v3698_v6 }
 0xea9   :  { %v1396_v47 = vpop.f32.mrb[18].mxu0 }
 0xeaa   :  { %v1397_v48 = vadd.f32 %v3880_v25, %v1396_v47  ;;  %v3176_v49 = vpop.f32.mrb[19].mxu0  ;;  %v2173_v47 = vstv %s2172_s13 }
 0xeac   :  { %v1407_v51 = vadd.f32 %v1406_v42, %v1397_v48 }
 0xeae   :  { %v1409_v52 = vmul.f32 %v1408_v50, %v1407_v51 }
 0xeb0   :  { %v4015_v53 = vadd.f32 %v1409_v52, %v3937_v1 }
 0xeb2   :  { %1412 = vst.msk [vmem:[#allocation2 + $0x10] sm:$0xff] %vm189_vm2, %v4015_v53  ;;  %3186 = vmatmul.mubr.msk.f32.vlgmr.msra.gmra.mrb[14].mxu1 %vm189_vm2, %v4015_v53 }
 0xeb3   :  { %3486 = vmatpush3.bf16.msra.mxu1 %v3808_v5  ;;  %3207 = vmatprep.mubr.msk.f32.mxu1 %vm3697_vm1, %v3696_v2 }
 0xeb4   :  { %3487 = vmatprep.subr.bf16.mxu1 %v3698_v6 }
 0xeb7   :  { %3489 = vmatpush3.bf16.msra.mxu1 %v3827_v9 }
 0xeb8   :  { %3496 = vmatprep.subr.bf16.mxu1 %v3698_v6 }
 0xf85   :  { %v1483_v54 = vpop.f32.mrb[14].mxu1 }
 0xf86   :  { %v1484_v55 = vadd.f32 %v3867_v20, %v1483_v54  ;;  %v3187_v56 = vpop.f32.mrb[15].mxu1 }
 0xf88   :  { %v1487_v57 = vmax.f32 %v1484_v55, 0.0 }
 0xf8a   :  { %3197 = vmatmul.mubr.msk.f32.vlgmr.msra.gmra.mrb[20].mxu0 %vm189_vm2, %v1487_v57 }
 0xf8b   :  { %3492 = vmatpush3.bf16.msra.mxu0 %v3842_v14  ;;  %3218 = vmatprep.mubr.msk.f32.mxu0 %vm3697_vm1, %v3696_v2 }
 0xf8c   :  { %3493 = vmatprep.subr.bf16.mxu0 %v3698_v6 }
 0xf8f   :  { %3495 = vmatpush3.bf16.msra.mxu0 %v3860_v19 }
 0xf90   :  { %3502 = vmatprep.subr.bf16.mxu0 %v3698_v6 }
0x105d   :  { %v1557_v58 = vpop.f32.mrb[20].mxu0 }
0x105e   :  { %v1558_v60 = vadd.f32 %v3880_v25, %v1557_v58  ;;  %v3198_v61 = vpop.f32.mrb[21].mxu0 }
0x1060   :  { %v1563_v62 = vmul.f32 %v1562_v59, %v1558_v60 }
0x1062   :  { %v1564_v63 = vadd.f32 %v1563_v62, %v4015_v53 }
0x1064   :  { %3208 = vmatmul.mubr.msk.f32.vlgmr.msra.gmra.mrb[16].mxu1 %vm189_vm2, %v1564_v63 }
0x1065   :  { %3498 = vmatpush3.bf16.msra.mxu1 %v3808_v5  ;;  %3229 = vmatprep.mubr.msk.f32.mxu1 %vm3697_vm1, %v3696_v2 }
0x1066   :  { %3499 = vmatprep.subr.bf16.mxu1 %v3698_v6 }
0x1069   :  { %3501 = vmatpush3.bf16.msra.mxu1 %v3827_v9 }
0x106a   :  { %3508 = vmatprep.subr.bf16.mxu1 %v3698_v6 }
0x1137   :  { %v1634_v0 = vpop.f32.mrb[16].mxu1 }
0x1138   :  { %v1635_v1 = vadd.f32 %v3867_v20, %v1634_v0  ;;  %v3209_v3 = vpop.f32.mrb[17].mxu1 }
0x113a   :  { %v1638_v4 = vmax.f32 %v1635_v1, 0.0  ;;  %v2472_v1 = vstv %s4113_s9 }
0x113c   :  { %3219 = vmatmul.mubr.msk.f32.vlgmr.msra.gmra.mrb[22].mxu0 %vm189_vm2, %v1638_v4 }
0x113d   :  { %3504 = vmatpush3.bf16.msra.mxu0 %v3842_v14  ;;  %3240 = vmatprep.mubr.msk.f32.mxu0 %vm3697_vm1, %v3696_v2 }
0x113e   :  { %3505 = vmatprep.subr.bf16.mxu0 %v3698_v6 }
0x1141   :  { %3507 = vmatpush3.bf16.msra.mxu0 %v3860_v19 }
0x1142   :  { %3514 = vmatprep.subr.bf16.mxu0 %v3698_v6 }
0x120f   :  { %v1708_v7 = vpop.f32.mrb[22].mxu0 }
0x1210   :  { %v1709_v8 = vadd.f32 %v3880_v25, %v1708_v7  ;;  %v3220_v10 = vpop.f32.mrb[23].mxu0  ;;  %v2640_v7 = vld [vmem:[%s4212_s8] sm:$0xff] }
0x1212   :  { %v1712_v11 = vmul.f32 %v1709_v8, %v1562_v59  ;;  %v2014_v18 = vmul.f32 2.0, %v1709_v8 }
0x1214   :  { %v1713_v12 = vadd.f32 %v1712_v11, %v4015_v53  ;;  %v2015_v26 = vadd.f32 %v2014_v18, %v1558_v60  ;;  %v2635_v18 = vld [vmem:[#allocation2] sm:$0xff] }
0x1216   :  { %3230 = vmatmul.mubr.msk.f32.vlgmr.msra.gmra.mrb[18].mxu1 %vm189_vm2, %v1713_v12 }
0x1217   :  { %3510 = vmatpush3.bf16.msra.mxu1 %v3808_v5  ;;  %3251 = vmatprep.mubr.msk.f32.mxu1 %vm3697_vm1, %v3696_v2 }
0x1218   :  { %3511 = vmatprep.subr.bf16.mxu1 %v3698_v6 }
0x121b   :  { %3513 = vmatpush3.bf16.msra.mxu1 %v3827_v9 }
0x121c   :  { %3520 = vmatprep.subr.bf16.mxu1 %v3698_v6 }
0x12e9   :  { %v1783_v13 = vpop.f32.mrb[18].mxu1 }
0x12ea   :  { %v1784_v15 = vadd.f32 %v3867_v20, %v1783_v13  ;;  %v3231_v16 = vpop.f32.mrb[19].mxu1  ;;  %v2642_v13 = vld [vmem:[%s4212_s8 + $0x10] sm:$0xff] }
0x12ec   :  { %v1787_v17 = vmax.f32 %v1784_v15, 0.0  ;;  %v2643_v15 = vld [vmem:[%s4212_s8 + $0x18] sm:$0xff] }
0x12ee   :  { %3241 = vmatmul.mubr.msk.f32.vlgmr.msra.gmra.mrb[24].mxu0 %vm189_vm2, %v1787_v17  ;;  %v3572_v17 = vpack.c.bf16 %v2643_v15, %v2642_v13 }
0x12ef   :  { %3516 = vmatpush3.bf16.msra.mxu0 %v3842_v14  ;;  %3262 = vmatprep.mubr.msk.f32.mxu0 %vm3697_vm1, %v3696_v2 }
0x12f0   :  { %3517 = vmatprep.subr.bf16.mxu0 %v3698_v6 }
0x12f3   :  { %3519 = vmatpush3.bf16.msra.mxu0 %v3860_v19 }
0x12f4   :  { %3526 = vmatprep.subr.bf16.mxu0 %v3698_v6 }
0x13c1   :  { %v1857_v21 = vpop.f32.mrb[24].mxu0 }
0x13c2   :  { %v1858_v23 = vadd.f32 %v3880_v25, %v1857_v21  ;;  %v3242_v24 = vpop.f32.mrb[25].mxu0  ;;  %v2636_v21 = vld [vmem:[#allocation2 + $0x8] sm:$0xff] }
0x13c4   :  { %v1862_v27 = vmul.f32 %v1861_v22, %v1858_v23  ;;  %v2016_v28 = vmul.f32 2.0, %v1858_v23  ;;  %v2637_v22 = vld [vmem:[#allocation2 + $0x10] sm:$0xff] }
0x13c6   :  { %v1863_v29 = vadd.f32 %v1862_v27, %v4015_v53  ;;  %v2017_v30 = vadd.f32 %v2016_v28, %v2015_v26  ;;  %v2819_v28 = vld [vmem:[#allocation10] ss:$0 sm:$0xff] }
0x13c8   :  { %3252 = vmatmul.mubr.msk.f32.vlgmr.msra.gmra.mrb[20].mxu1 %vm189_vm2, %v1863_v29 }
0x13c9   :  { %3522 = vmatpush3.bf16.msra.mxu1 %v3808_v5  ;;  %3273 = vmatprep.mubr.msk.f32.mxu1 %vm3697_vm1, %v3696_v2 }
0x13ca   :  { %3523 = vmatprep.subr.bf16.mxu1 %v3698_v6 }
0x13cd   :  { %3525 = vmatpush3.bf16.msra.mxu1 %v3827_v9 }
0x13ce   :  { %3532 = vmatprep.subr.bf16.mxu1 %v3698_v6 }
0x149b   :  { %v1933_v31 = vpop.f32.mrb[20].mxu1 }
0x149c   :  { %v1934_v32 = vadd.f32 %v3867_v20, %v1933_v31  ;;  %v3253_v33 = vpop.f32.mrb[21].mxu1 }
0x149e   :  { %v1937_v34 = vmax.f32 %v1934_v32, 0.0 }
0x14a0   :  { %3263 = vmatmul.mubr.msk.f32.vlgmr.msra.gmra.mrb[26].mxu0 %vm189_vm2, %v1937_v34 }
0x14a1   :  { %3528 = vmatpush3.bf16.msra.mxu0 %v3842_v14  ;;  %3284 = vmatprep.mubr.msk.f32.mxu0 %vm3697_vm1, %v3696_v2 }
0x14a2   :  { %3529 = vmatprep.subr.bf16.mxu0 %v3698_v6 }
0x14a5   :  { %3531 = vmatpush3.bf16.msra.mxu0 %v3860_v19 }
0x14a6   :  { %3538 = vmatprep.subr.bf16.mxu0 %v3698_v6 }
0x1573   :  { %v2007_v35 = vpop.f32.mrb[26].mxu0 }
0x1574   :  { %v2008_v36 = vadd.f32 %v3880_v25, %v2007_v35  ;;  %v3264_v37 = vpop.f32.mrb[27].mxu0 }
0x1576   :  { %v2018_v39 = vadd.f32 %v2017_v30, %v2008_v36 }
0x1578   :  { %v2020_v40 = vmul.f32 %v2019_v38, %v2018_v39 }
0x157a   :  { %v4093_v41 = vadd.f32 %v2020_v40, %v4015_v53 }
0x157c   :  { %2023 = vst.msk [vmem:[#allocation2 + $0x18] sm:$0xff] %vm189_vm2, %v4093_v41  ;;  %3274 = vmatmul.mubr.msk.f32.vlgmr.msra.gmra.mrb[22].mxu1 %vm189_vm2, %v4093_v41 }
0x157d   :  { %3534 = vmatpush3.bf16.msra.mxu1 %v3808_v5  ;;  %3295 = vmatprep.mubr.msk.f32.mxu1 %vm3697_vm1, %v3696_v2 }
0x157e   :  { %3535 = vmatprep.subr.bf16.mxu1 %v3698_v6 }
0x1581   :  { %3537 = vmatpush3.bf16.msra.mxu1 %v3827_v9 }
0x1582   :  { %3544 = vmatprep.subr.bf16.mxu1 %v3698_v6 }
0x164f   :  { %v2094_v42 = vpop.f32.mrb[22].mxu1 }
0x1650   :  { %v2095_v43 = vadd.f32 %v3867_v20, %v2094_v42  ;;  %v3275_v44 = vpop.f32.mrb[23].mxu1 }
0x1652   :  { %v2098_v45 = vmax.f32 %v2095_v43, 0.0 }
0x1654   :  { %3285 = vmatmul.mubr.msk.f32.vlgmr.msra.gmra.mrb[28].mxu0 %vm189_vm2, %v2098_v45 }
0x1655   :  { %3540 = vmatpush3.bf16.msra.mxu0 %v3842_v14  ;;  %3306 = vmatprep.mubr.msk.f32.mxu0 %vm3697_vm1, %v3696_v2 }
0x1656   :  { %3541 = vmatprep.subr.bf16.mxu0 %v3698_v6 }
0x1659   :  { %3543 = vmatpush3.bf16.msra.mxu0 %v3860_v19 }
0x165a   :  { %3550 = vmatprep.subr.bf16.mxu0 %v3698_v6 }
0x1727   :  { %v2168_v46 = vpop.f32.mrb[28].mxu0 }
0x1728   :  { %v2169_v48 = vadd.f32 %v3880_v25, %v2168_v46  ;;  %v3286_v49 = vpop.f32.mrb[29].mxu0 }
0x172a   :  { %v2174_v50 = vmul.f32 %v2173_v47, %v2169_v48 }
0x172c   :  { %v2175_v51 = vadd.f32 %v2174_v50, %v4093_v41 }
0x172e   :  { %3296 = vmatmul.mubr.msk.f32.vlgmr.msra.gmra.mrb[24].mxu1 %vm189_vm2, %v2175_v51 }
0x172f   :  { %3546 = vmatpush3.bf16.msra.mxu1 %v3808_v5  ;;  %3317 = vmatprep.mubr.msk.f32.mxu1 %vm3697_vm1, %v3696_v2 }
0x1730   :  { %3547 = vmatprep.subr.bf16.mxu1 %v3698_v6 }
0x1733   :  { %3549 = vmatpush3.bf16.msra.mxu1 %v3827_v9 }
0x1734   :  { %3556 = vmatprep.subr.bf16.mxu1 %v3698_v6 }
0x1801   :  { %v2245_v52 = vpop.f32.mrb[24].mxu1 }
0x1802   :  { %v2246_v53 = vadd.f32 %v3867_v20, %v2245_v52  ;;  %v3297_v54 = vpop.f32.mrb[25].mxu1 }
0x1804   :  { %v2249_v55 = vmax.f32 %v2246_v53, 0.0 }
0x1806   :  { %3307 = vmatmul.mubr.msk.f32.vlgmr.msra.gmra.mrb[30].mxu0 %vm189_vm2, %v2249_v55 }
0x1807   :  { %3552 = vmatpush3.bf16.msra.mxu0 %v3842_v14  ;;  %3328 = vmatprep.mubr.msk.f32.mxu0 %vm3697_vm1, %v3696_v2 }
0x1808   :  { %3553 = vmatprep.subr.bf16.mxu0 %v3698_v6 }
0x180b   :  { %3555 = vmatpush3.bf16.msra.mxu0 %v3860_v19 }
0x180c   :  { %3562 = vmatprep.subr.bf16.mxu0 %v3698_v6 }
0x18d9   :  { %v2319_v56 = vpop.f32.mrb[30].mxu0 }
0x18da   :  { %v2320_v57 = vadd.f32 %v3880_v25, %v2319_v56  ;;  %v3308_v58 = vpop.f32.mrb[31].mxu0 }
0x18dc   :  { %v2323_v59 = vmul.f32 %v2320_v57, %v2173_v47 }
0x18de   :  { %v2324_v60 = vadd.f32 %v2323_v59, %v4093_v41 }
0x18e0   :  { %3318 = vmatmul.mubr.msk.f32.vlgmr.msra.gmra.mrb[26].mxu1 %vm189_vm2, %v2324_v60 }
0x18e1   :  { %3558 = vmatpush3.bf16.msra.mxu1 %v3808_v5  ;;  %3339 = vmatprep.mubr.msk.f32.mxu1 %vm3697_vm1, %v3696_v2  ;;  %v2625_v5 = vmul.f32 2.0, %v2320_v57 }
0x18e2   :  { %3559 = vmatprep.subr.bf16.mxu1 %v3698_v6 }
0x18e3   :  { %v2626_v8 = vadd.f32 %v2625_v5, %v2169_v48 }
0x18e5   :  { %3561 = vmatpush3.bf16.msra.mxu1 %v3827_v9 }
0x18e6   :  { %3568 = vmatprep.subr.bf16.mxu1 %v3698_v6 }
0x19b3   :  { %v2394_v61 = vpop.f32.mrb[26].mxu1 }
0x19b4   :  { %v2395_v62 = vadd.f32 %v3867_v20, %v2394_v61  ;;  %v3319_v63 = vpop.f32.mrb[27].mxu1 }
0x19b6   :  { %v2398_v0 = vmax.f32 %v2395_v62, 0.0 }
0x19b8   :  { %3329 = vmatmul.mubr.msk.f32.vlgmr.msra.gmra.mrb[32].mxu0 %vm189_vm2, %v2398_v0 }
0x19b9   :  { %3564 = vmatpush3.bf16.msra.mxu0 %v3842_v14  ;;  %3350 = vmatprep.mubr.msk.f32.mxu0 %vm3697_vm1, %v3696_v2  ;;  %v2641_v14 = vld [vmem:[%s4212_s8 + $0x8] sm:$0xff]  ;;  %s2624_s8 = smul.f32 0.16666667, %s4113_s9 }
0x19ba   :  { %3565 = vmatprep.subr.bf16.mxu0 %v3698_v6  ;;  %v3569_v12 = vpack.c.bf16 %v2641_v14, %v2640_v7 }
0x19bb   :  { %v2630_v43 = vstv %s2624_s8 }
0x19bd   :  { %3567 = vmatpush3.bf16.msra.mxu0 %v3860_v19 }
0x1a8b   :  { %v2468_v9 = vpop.f32.mrb[32].mxu0 }
0x1a8c   :  { %v2469_v3 = vadd.f32 %v3880_v25, %v2468_v9  ;;  %v3330_v4 = vpop.f32.mrb[33].mxu0 }
0x1a8e   :  { %v2473_v10 = vmul.f32 %v2472_v1, %v2469_v3  ;;  %v2627_v11 = vmul.f32 2.0, %v2469_v3 }
0x1a90   :  { %v2474_v19 = vadd.f32 %v2473_v10, %v4093_v41  ;;  %v2628_v16 = vadd.f32 %v2627_v11, %v2626_v8 }
0x1a92   :  { %3340 = vmatmul.mubr.msk.f32.vlgmr.msra.gmra.mrb[28].mxu1 %vm189_vm2, %v2474_v19 }
0x1a93   :  { %3570 = vmatpush3.bf16.msra.mxu1 %v3569_v12  ;;  %3361 = vmatprep.mubr.msk.f32.mxu1 %vm3697_vm1, %v3696_v2 }
0x1a94   :  { %3571 = vmatprep.subr.bf16.mxu1 %v3698_v6  ;;  %v2638_v6 = vld [vmem:[#allocation2 + $0x18] sm:$0xff] }
0x1a97   :  { %3573 = vmatpush3.bf16.msra.mxu1 %v3572_v17 }
0x1a9a   :  { %3362 = vmatmul.mubr.msk.f32.vlgmr.msra.gmra.mrb[30].mxu1 %vm189_vm2, %v2635_v18 }
0x1a9b   :  { %3364 = vmatprep.mubr.msk.f32.mxu1 %vm3697_vm1, %v3696_v2 }
0x1a9e   :  { %3365 = vmatmul.mubr.msk.f32.gmra.mrb[32].mxu1 %vm189_vm2, %v2636_v21 }
0x1a9f   :  { %3367 = vmatprep.mubr.msk.f32.mxu1 %vm3697_vm1, %v3696_v2 }
0x1aa2   :  { %3368 = vmatmul.mubr.msk.f32.gmra.mrb[34].mxu1 %vm189_vm2, %v2637_v22 }
0x1aa3   :  { %3370 = vmatprep.mubr.msk.f32.mxu1 %vm3697_vm1, %v3696_v2 }
0x1aa6   :  { %3371 = vmatmul.mubr.msk.f32.gmra.mrb[36].mxu1 %vm189_vm2, %v2638_v6 }
0x1aa7   :  { %3373 = vmatprep.mubr.msk.f32.mxu1 %vm3697_vm1, %v3696_v2 }
0x1b65   :  { %v2544_v23 = vpop.f32.mrb[28].mxu1 }
0x1b66   :  { %v2545_v24 = vadd.f32 %v3867_v20, %v2544_v23  ;;  %v3341_v26 = vpop.f32.mrb[29].mxu1 }
0x1b68   :  { %v2548_v27 = vmax.f32 %v2545_v24, 0.0 }
0x1b6a   :  { %3351 = vmatmul.mubr.msk.f32.vlgmr.msra.gmra.mrb[34].mxu0 %vm189_vm2, %v2548_v27 }
0x1b6d   :  { %v2732_v29 = vpop.f32.mrb[30].mxu1 }
0x1b6e   :  { %v2733_v30 = vadd.f32 %v2819_v28, %v2732_v29  ;;  %v3363_v31 = vpop.f32.mrb[31].mxu1 }
0x1b70   :  { %2756 = vst.msk [vmem:[#allocation11] sm:$0xff] %vm115_vm0, %v2733_v30 }
0x1b71   :  { %v2737_v32 = vpop.f32.mrb[32].mxu1 }
0x1b72   :  { %v2738_v33 = vadd.f32 %v2819_v28, %v2737_v32  ;;  %v3366_v34 = vpop.f32.mrb[33].mxu1 }
0x1b74   :  { %2757 = vst.msk [vmem:[#allocation11 + $0x8] sm:$0xff] %vm115_vm0, %v2738_v33 }
0x1b75   :  { %v2742_v2 = vpop.f32.mrb[34].mxu1 }
0x1b76   :  { %v2743_v35 = vadd.f32 %v2819_v28, %v2742_v2  ;;  %v3369_v36 = vpop.f32.mrb[35].mxu1 }
0x1b78   :  { %2758 = vst.msk [vmem:[#allocation11 + $0x10] sm:$0xff] %vm115_vm0, %v2743_v35 }
0x1b79   :  { %v2747_v20 = vpop.f32.mrb[36].mxu1 }
0x1b7a   :  { %v2748_v37 = vadd.f32 %v2819_v28, %v2747_v20  ;;  %v3372_v38 = vpop.f32.mrb[37].mxu1 }
0x1b7c   :  { %2759 = vst.msk [vmem:[#allocation11 + $0x18] sm:$0xff] %vm115_vm0, %v2748_v37 }
0x1c3d   :  { %v2618_v39 = vpop.f32.mrb[34].mxu0 }
0x1c3e   :  { %v2619_v40 = vadd.f32 %v3880_v25, %v2618_v39  ;;  %v3352_v42 = vpop.f32.mrb[35].mxu0 }
0x1c40   :  { %v2629_v44 = vadd.f32 %v2628_v16, %v2619_v40 }
0x1c42   :  { %v2631_v45 = vmul.f32 %v2630_v43, %v2629_v44 }
0x1c44   :  { %v2632_v46 = vadd.f32 %v2631_v45, %v4093_v41 }
0x1c46   :  { %2634 = vst.msk [vmem:[#allocation2 + $0x20] sm:$0xff] %vm189_vm2, %v2632_v46 }
0x1c4d   :  { %v2639_v47 = vld [vmem:[#allocation2 + $0x20] sm:$0xff] }
0x1c4e   :  { %3374 = vmatmul.mubr.msk.f32.gmra.mrb[38].mxu1 %vm189_vm2, %v2639_v47 }
0x1d21   :  { %v2752_v48 = vpop.f32.mrb[38].mxu1 }
0x1d22   :  { %v2753_v49 = vadd.f32 %v2819_v28, %v2752_v48  ;;  %v3375_v50 = vpop.f32.mrb[39].mxu1 }
0x1d24   :  { %2760 = vst.msk [vmem:[#allocation11 + $0x20] sm:$0xff] %vm115_vm0, %v2753_v49 }
0x1d25   :  { %3673 = shalt.err (!%p3670_p5)
}
0x1d26   :  { %s3674_s24 = scalar_lea.hbm %s4214_s10, 640 }
0x1d27   :  { %p3675_p6 = scmp.ne.s32.totalorder %s4214_s10, %s3674_s24  ;;  %p3678_p7 = scmp.lt.u32.totalorder %s3674_s24, %s4214_s10 }
0x1d29   :  { %p3680_p8 = pnand %p3678_p7, %p3675_p6 }
0x1d2b   :  { %3683 = shalt.err (!%p3680_p8)
}
0x1d2c   :  { %s3700_s5 = smov 128   ;;  %s3701_s6 = smov 8  }
0x1d2d   :  { %2772 = dma.vmem_to_hbm [thread:$0]  %s2767_s22, 640, %s4214_s10, [#allocation5], %s3700_s5, %s3700_s5, %s3701_s6  }
0x1d2e   :  { %3690 = dma.done.wait [#allocation5], 640  }
0x1d2f   :  { %3691 = vsyncadd [#allocation5], 4294966656 }
0x1d30   :  { %2776 = vsyncpa [#allocation4], 1 }
0x1d31   :  { %2777 = vsyncpa [#allocation9], 1 }
0x1d32   :  { %2778 = vsyncpa [#allocation5], 1 }
0x1d33   :  { %2779 = vsyncpa [#allocation6], 1 }

</bundles_post_ra>
